<compile_context>
chip_gen: v6e
topology: v6e:2x2x1
jax: 0.10.0
libtpu: 0.0.40
codegen_flags: <defaults>
</compile_context>

<pallas_src>
import functools
import numpy as np

import jax
import jax.numpy as jnp
from jax import lax
from jax.experimental import pallas as pl
from jax.experimental.pallas import tpu as pltpu

LN_EPS = 1e-3            # LayerNormalization eps=0.001, added to sigma (unbiased std)
NEG_BIAS = -1e30         # finite mask value: no -inf -> NaN hazard in online softmax
_VMEM_LIMIT = 48 * 1024 * 1024   # explicit scoped-VMEM limit (headroom on v7x's 64 MiB)


# --------------------------------------------------------------------------
# Helpers
# --------------------------------------------------------------------------

def _round_up(x, m):
    return ((x + m - 1) // m) * m


def _plan_tiles(T, max_tile=512):
    """Row/kv tile and padded token count.  Tiles are multiples of 8 (and of 128 when
    T is large); T is padded up to a multiple of the tile instead of degenerating to a
    single giant tile."""
    max_tile = max(8, (max_tile // 8) * 8)
    padded = _round_up(T, 8)
    if padded <= max_tile:
        return padded, padded                     # single tile
    padded = _round_up(T, 128)
    for t in (512, 256, 128):
        if t <= max_tile and padded % t == 0:
            return padded, t
    padded = _round_up(T, max_tile)               # small max_tile (testing only)
    return padded, max_tile


def _layer_norm(y, g, b, eps):
    # LayerNormalization: unbiased std (torch.std default), eps added to sigma.
    mu = jnp.mean(y, axis=-1, keepdims=True)
    diff = y - mu
    var = jnp.sum(diff * diff, axis=-1, keepdims=True) / (y.shape[-1] - 1)
    return diff / (jnp.sqrt(var) + eps) * g + b


# --------------------------------------------------------------------------
# Flash-style fused multi-head attention
#   (QKV proj + masked online-softmax attention + output proj + residual + LayerNorm)
# --------------------------------------------------------------------------

def _attn_tile(start, end, qk_q, qk_kv, v_kv, resid,
               wq_ref, wk_ref, wv_ref, wp_ref, g_ref, b_ref,
               o_ref, m_ref, l_ref, acc_ref, *, n_head, scale, eps):
    ki = pl.program_id(1)
    nk = pl.num_programs(1)
    tq = qk_q.shape[0]
    tk = qk_kv.shape[0]

    @pl.when(ki == 0)
    def _init():
        m_ref[...] = jnp.full_like(m_ref, NEG_BIAS)
        l_ref[...] = jnp.zeros_like(l_ref)
        acc_ref[...] = jnp.zeros_like(acc_ref)

    # Segment mask built on the fly: kv position must lie in [start, end) of the query's
    # sequence (segments are contiguous in the packed layout).
    kv_pos = lax.broadcasted_iota(jnp.int32, (tq, tk), 1) + ki * tk
    mask = (kv_pos >= start) & (kv_pos < end)               # [tq, tk]
    bias = jnp.where(mask, 0.0, NEG_BIAS)

    qk_q16 = qk_q.astype(jnp.bfloat16)
    qk_kv16 = qk_kv.astype(jnp.bfloat16)
    v_kv16 = v_kv.astype(jnp.bfloat16)

    for h in range(n_head):                                  # static unroll (n_head small)
        q_h = jnp.dot(qk_q16, wq_ref[h], preferred_element_type=jnp.float32)   # [tq, d_k]
        k_h = jnp.dot(qk_kv16, wk_ref[h], preferred_element_type=jnp.float32)  # [tk, d_k]
        v_h = jnp.dot(v_kv16, wv_ref[h], preferred_element_type=jnp.float32)   # [tk, d_v]

        # q @ k^T via dot_general contracting last dims (no explicit transpose).
        s = lax.dot_general(q_h.astype(jnp.bfloat16), k_h.astype(jnp.bfloat16),
                            (((1,), (1,)), ((), ())),
                            preferred_element_type=jnp.float32) * scale + bias  # [tq, tk]

        m_prev = m_ref[h]
        m_new = jnp.maximum(m_prev, jnp.max(s, axis=-1, keepdims=True))
        alpha = jnp.exp(m_prev - m_new)
        p = jnp.exp(s - m_new)
        l_ref[h] = alpha * l_ref[h] + jnp.sum(p, axis=-1, keepdims=True)
        acc_ref[h] = alpha * acc_ref[h] + jnp.dot(
            p.astype(jnp.bfloat16), v_h.astype(jnp.bfloat16),
            preferred_element_type=jnp.float32)
        m_ref[h] = m_new

    @pl.when(ki == nk - 1)
    def _finalize():
        # proj(concat_h o_h) == sum_h o_h @ Wp_h -> no lane-relayout concat needed.
        y = resid
        for h in range(n_head):
            o_h = acc_ref[h] * pl.reciprocal(l_ref[h], approx=True)   # EUP slot
            y = y + jnp.dot(o_h.astype(jnp.bfloat16), wp_ref[h],
                            preferred_element_type=jnp.float32)
        o_ref[...] = _layer_norm(y, g_ref[...], b_ref[...], eps)


def _mha_self_kernel(st_ref, en_ref, xq_ref, xkv_ref,
                     wq_ref, wk_ref, wv_ref, wp_ref, g_ref, b_ref,
                     o_ref, m_ref, l_ref, acc_ref, *, n_head, scale, eps):
    xq = xq_ref[...]
    xkv = xkv_ref[...]            # loaded once, used for both K and V projections
    _attn_tile(st_ref[...], en_ref[...], xq, xkv, xkv, xq,
               wq_ref, wk_ref, wv_ref, wp_ref, g_ref, b_ref,
               o_ref, m_ref, l_ref, acc_ref, n_head=n_head, scale=scale, eps=eps)


def _mha_cross_kernel(st_ref, en_ref, sq_ref, skv_ref, xkv_ref, xq_ref,
                      wq_ref, wk_ref, wv_ref, wp_ref, g_ref, b_ref,
                      o_ref, m_ref, l_ref, acc_ref, *, n_head, scale, eps):
    # Reference semantics: queries/keys from qk_inp (src), values + residual from inp (x).
    _attn_tile(st_ref[...], en_ref[...], sq_ref[...], skv_ref[...], xkv_ref[...],
               xq_ref[...], wq_ref, wk_ref, wv_ref, wp_ref, g_ref, b_ref,
               o_ref, m_ref, l_ref, acc_ref, n_head=n_head, scale=scale, eps=eps)


def _attn_cost(T, d_model, n_head, d_k, d_v):
    flops = 2 * T * d_model * n_head * (2 * d_k + d_v)      # QKV projections
    flops += 2 * n_head * T * T * (d_k + d_v)               # scores + attn @ V
    flops += 2 * T * n_head * d_v * d_model                 # output projection
    byts = 4 * 3 * T * d_model + 2 * n_head * d_model * (2 * d_k + d_v) \
        + 2 * n_head * d_v * d_model + 8 * T
    return pl.CostEstimate(flops=int(flops), transcendentals=int(n_head * T * T),
                           bytes_accessed=int(byts))


def fused_mha(params, x, seg_start, seg_end, n_head, d_k, d_v, *, tq, tk, qk_inp=None):
    """MultiHeadAttention.forward (eval): LayerNorm(proj(attn) + x), flash-tiled."""
    wq, wk, wv, wp, g, b = params
    T, d_model = x.shape
    nq, nk = T // tq, T // tk
    scale = 1.0 / float(d_model) ** 0.5     # ScaledDotProductAttention temper = d_model**0.5
    g2, b2 = g.reshape(1, -1), b.reshape(1, -1)

    qrow = lambda qi, ki: (qi, 0)
    kvrow = lambda qi, ki: (ki, 0)
    const2 = lambda qi, ki: (0, 0)
    const3 = lambda qi, ki: (0, 0, 0)

    seg_spec = pl.BlockSpec((tq, 1), qrow)
    q_spec = pl.BlockSpec((tq, d_model), qrow)
    kv_spec = pl.BlockSpec((tk, d_model), kvrow)
    w_specs = [pl.BlockSpec(wq.shape, const3), pl.BlockSpec(wk.shape, const3),
               pl.BlockSpec(wv.shape, const3), pl.BlockSpec(wp.shape, const3)]
    ln_specs = [pl.BlockSpec((1, d_model), const2), pl.BlockSpec((1, d_model), const2)]

    common = dict(n_head=n_head, scale=scale, eps=LN_EPS)
    if qk_inp is None:
        kernel = functools.partial(_mha_self_kernel, **common)
        in_specs = [seg_spec, seg_spec, q_spec, kv_spec] + w_specs + ln_specs
        args = (seg_start, seg_end, x, x, wq, wk, wv, wp, g2, b2)
    else:
        kernel = functools.partial(_mha_cross_kernel, **common)
        in_specs = [seg_spec, seg_spec, q_spec, kv_spec, kv_spec, q_spec] + w_specs + ln_specs
        args = (seg_start, seg_end, qk_inp, qk_inp, x, x, wq, wk, wv, wp, g2, b2)

    return pl.pallas_call(
        kernel,
        out_shape=jax.ShapeDtypeStruct((T, d_model), jnp.float32),
        grid=(nq, nk),
        in_specs=in_specs,
        out_specs=pl.BlockSpec((tq, d_model), qrow),
        scratch_shapes=[pltpu.VMEM((n_head, tq, 1), jnp.float32),   # running max
                        pltpu.VMEM((n_head, tq, 1), jnp.float32),   # running sum
                        pltpu.VMEM((n_head, tq, d_v), jnp.float32)],  # output accumulator
        compiler_params=pltpu.CompilerParams(
            dimension_semantics=("parallel", "arbitrary"),
            vmem_limit_bytes=_VMEM_LIMIT),
        cost_estimate=_attn_cost(T, d_model, n_head, d_k, d_v),
    )(*args)


# --------------------------------------------------------------------------
# Position-wise FFN (w1 -> ReLU -> w2 -> residual -> LayerNorm), row-tiled
# --------------------------------------------------------------------------

def _ffn_kernel(x_ref, w1_ref, b1_ref, w2_ref, b2_ref, g_ref, b_ref, o_ref, *, eps):
    x = x_ref[...]
    h = jnp.dot(x.astype(jnp.bfloat16), w1_ref[...],
                preferred_element_type=jnp.float32) + b1_ref[...]
    h = jnp.maximum(h, 0.0)
    y = jnp.dot(h.astype(jnp.bfloat16), w2_ref[...],
                preferred_element_type=jnp.float32) + b2_ref[...] + x
    o_ref[...] = _layer_norm(y, g_ref[...], b_ref[...], eps)


def ffn_block(params, x, *, row_tile):
    w1, b1, w2, b2, g, b = params
    T, d_model = x.shape
    d_ff = w1.shape[1]
    kernel = functools.partial(_ffn_kernel, eps=LN_EPS)
    flops = 4 * T * d_model * d_ff
    byts = 8 * T * d_model + 4 * d_model * d_ff
    return pl.pallas_call(
        kernel,
        out_shape=jax.ShapeDtypeStruct((T, d_model), jnp.float32),
        grid=(T // row_tile,),
        in_specs=[
            pl.BlockSpec((row_tile, d_model), lambda i: (i, 0)),
            pl.BlockSpec((d_model, d_ff), lambda i: (0, 0)),   # bf16 weights stay resident
            pl.BlockSpec((1, d_ff), lambda i: (0, 0)),
            pl.BlockSpec((d_ff, d_model), lambda i: (0, 0)),
            pl.BlockSpec((1, d_model), lambda i: (0, 0)),
            pl.BlockSpec((1, d_model), lambda i: (0, 0)),
            pl.BlockSpec((1, d_model), lambda i: (0, 0)),
        ],
        out_specs=pl.BlockSpec((row_tile, d_model), lambda i: (i, 0)),
        compiler_params=pltpu.CompilerParams(dimension_semantics=("parallel",),
                                             vmem_limit_bytes=_VMEM_LIMIT),
        cost_estimate=pl.CostEstimate(flops=int(flops), transcendentals=0,
                                      bytes_accessed=int(byts)),
    )(x, w1, b1.reshape(1, -1), w2, b2.reshape(1, -1), g.reshape(1, -1), b.reshape(1, -1))


# --------------------------------------------------------------------------
# Final vocabulary projection, tiled over rows AND vocab columns
# --------------------------------------------------------------------------

def _linear_kernel(x_ref, w_ref, b_ref, o_ref):
    o_ref[...] = jnp.dot(x_ref[...].astype(jnp.bfloat16), w_ref[...],
                         preferred_element_type=jnp.float32) + b_ref[...]


def final_linear(x, w, b, *, row_tile, col_tile=512):
    T, d_model = x.shape
    V = w.shape[1]
    if V > col_tile:
        padV = _round_up(V, col_tile)
        tn = col_tile
        if padV != V:
            w = jnp.pad(w, ((0, 0), (0, padV - V)))
            b = jnp.pad(b, ((0, padV - V),))
    else:
        padV, tn = V, V
    flops = 2 * T * d_model * padV
    byts = 4 * T * d_model + 2 * d_model * padV + 4 * T * padV
    out = pl.pallas_call(
        _linear_kernel,
        out_shape=jax.ShapeDtypeStruct((T, padV), jnp.float32),
        grid=(T // row_tile, padV // tn),
        in_specs=[
            pl.BlockSpec((row_tile, d_model), lambda i, j: (i, 0)),
            pl.BlockSpec((d_model, tn), lambda i, j: (0, j)),
            pl.BlockSpec((1, tn), lambda i, j: (0, j)),
        ],
        out_specs=pl.BlockSpec((row_tile, tn), lambda i, j: (i, j)),
        compiler_params=pltpu.CompilerParams(dimension_semantics=("parallel", "parallel"),
                                             vmem_limit_bytes=_VMEM_LIMIT),
        cost_estimate=pl.CostEstimate(flops=int(flops), transcendentals=0,
                                      bytes_accessed=int(byts)),
    )(x, w, b.reshape(1, -1))
    return out[:, :V]


# --------------------------------------------------------------------------
# Batch bookkeeping + module composition
# --------------------------------------------------------------------------

class BatchIdxs:
    """parse_nk BatchIndices analogue: packed variable-length sequences."""

    def __init__(self, lengths):
        lengths = np.asarray(lengths, dtype=np.int64)
        self.batch_size = int(len(lengths))
        self.max_len = int(lengths.max())
        self.boundaries_np = np.concatenate([[0], np.cumsum(lengths)])
        self.total = int(self.boundaries_np[-1])
        self.batch_ids = np.concatenate(
            [np.full(l, i, np.int32) for i, l in enumerate(lengths)])


def decoder_forward(params, cfg, tgt_ids, batch_idxs, src_enc, *, max_row_tile=512):
    T = batch_idxs.total
    padded_T, tile = _plan_tiles(T, max_row_tile)
    pad = padded_T - T

    # TODO(synk): the external `embedding` module is simplified to a plain table lookup.
    x = params["embedding"][tgt_ids]
    src = src_enc
    if pad:
        x = jnp.pad(x, ((0, pad), (0, 0)))
        if src is not None:
            src = jnp.pad(src, ((0, pad), (0, 0)))

    # Per-row segment boundaries; padded rows get an empty segment (fully masked,
    # finite math, sliced off at the end).
    starts = np.zeros((padded_T, 1), np.int32)
    ends = np.zeros((padded_T, 1), np.int32)
    for s, e in zip(batch_idxs.boundaries_np[:-1], batch_idxs.boundaries_np[1:]):
        starts[s:e, 0] = s
        ends[s:e, 0] = e
    seg_start = jnp.asarray(starts)
    seg_end = jnp.asarray(ends)

    h, dkv = cfg["num_heads"], cfg["d_kv"]
    for blk in params["blocks"]:
        x = fused_mha(blk["attn1"], x, seg_start, seg_end, h, dkv, dkv, tq=tile, tk=tile)
        if src is not None:
            x = fused_mha(blk["enc_dec"], x, seg_start, seg_end, h, dkv, dkv,
                          tq=tile, tk=tile, qk_inp=src)
        x = ffn_block(blk["ff"], x, row_tile=tile)

    w, bias = params["lin_final"]
    out = final_linear(x, w, bias, row_tile=tile)
    return out[:T]


# --------------------------------------------------------------------------
# Deterministic parameter construction (bf16 matmul weights, f32 biases / LN params)
# --------------------------------------------------------------------------

def _xavier(key, shape, fan_in, fan_out):
    std = np.sqrt(2.0 / (fan_in + fan_out))
    return jax.random.normal(key, shape, jnp.float32) * std


def make_mha_params(key, n_head, d_model, d_k, d_v):
    ks = jax.random.split(key, 4)
    w_q = _xavier(ks[0], (n_head, d_model, d_k), d_model, d_k).astype(jnp.bfloat16)
    w_k = _xavier(ks[1], (n_head, d_model, d_k), d_model, d_k).astype(jnp.bfloat16)
    w_v = _xavier(ks[2], (n_head, d_model, d_v), d_model, d_v).astype(jnp.bfloat16)
    # Linear(n_head*d_v, d_model, bias=False), stored head-major [H, d_v, d_model]
    w_proj = _xavier(ks[3], (n_head * d_v, d_model), n_head * d_v, d_model)
    w_proj = w_proj.reshape(n_head, d_v, d_model).astype(jnp.bfloat16)
    ln_g = jnp.ones((d_model,), jnp.float32)
    ln_b = jnp.zeros((d_model,), jnp.float32)
    return (w_q, w_k, w_v, w_proj, ln_g, ln_b)


def make_ff_params(key, d_model, d_ff):
    ks = jax.random.split(key, 2)
    w1 = _xavier(ks[0], (d_model, d_ff), d_model, d_ff).astype(jnp.bfloat16)
    b1 = jnp.zeros((d_ff,), jnp.float32)
    w2 = _xavier(ks[1], (d_ff, d_model), d_ff, d_model).astype(jnp.bfloat16)
    b2 = jnp.zeros((d_model,), jnp.float32)
    g = jnp.ones((d_model,), jnp.float32)
    b = jnp.zeros((d_model,), jnp.float32)
    return (w1, b1, w2, b2, g, b)


def make_decoder_params(key, vocab_size, d_model, d_ff, d_kv, num_blocks, num_heads):
    keys = jax.random.split(key, 2 + 3 * num_blocks)
    params = {
        "embedding": _xavier(keys[0], (vocab_size, d_model), vocab_size, d_model),
        "blocks": [],
        "lin_final": (
            _xavier(keys[1], (d_model, vocab_size), d_model, vocab_size).astype(jnp.bfloat16),
            jnp.zeros((vocab_size,), jnp.float32),
        ),
    }
    for i in range(num_blocks):
        k0, k1, k2 = keys[2 + 3 * i: 5 + 3 * i]
        params["blocks"].append({
            "attn1": make_mha_params(k0, num_heads, d_model, d_kv, d_kv),
            "enc_dec": make_mha_params(k1, num_heads, d_model, d_kv, d_kv),
            "ff": make_ff_params(k2, d_model, d_ff),
        })
    return params


# --------------------------------------------------------------------------

if __name__ == "__main__":
    cfg = dict(vocab_size=16, d_model=32, d_ff=64, d_kv=16, num_blocks=2, num_heads=2)

    lengths = [9, 7]                    # two packed sequences -> T = 16 tokens
    batch_idxs = BatchIdxs(lengths)
    T = batch_idxs.total

    key = jax.random.PRNGKey(0)
    k_par, k_tgt, k_src = jax.random.split(key, 3)

    params = make_decoder_params(
        k_par, cfg["vocab_size"], cfg["d_model"], cfg["d_ff"],
        cfg["d_kv"], cfg["num_blocks"], cfg["num_heads"])

    tgt_ids = jax.random.randint(k_tgt, (T,), 0, cfg["vocab_size"], dtype=jnp.int32)
    src_enc = jax.random.normal(k_src, (T, cfg["d_model"]), jnp.float32)

    # max_row_tile=8 forces a 2x2 (q-rows x kv) grid at this toy size so the flash-style
    # multi-tile online-softmax (incl. fully-masked kv tiles) is actually exercised;
    # the production default is 512-row tiles.
    out = decoder_forward(params, cfg, tgt_ids, batch_idxs, src_enc, max_row_tile=8)
    out = jax.block_until_ready(out)
    assert out.shape == (T, cfg["vocab_size"]), out.shape
    assert bool(jnp.all(jnp.isfinite(out)))
    print("KERNEL_OK")
</pallas_src>

<mosaic_0001>
module attributes {stable_mosaic.version = 11 : i64} {
  func.func @_mha_self_kernel(%arg0: i32, %arg1: i32, %arg2: memref<8x1xi32, #tpu.memory_space<vmem>>, %arg3: memref<8x1xi32, #tpu.memory_space<vmem>>, %arg4: memref<8x32xf32, #tpu.memory_space<vmem>>, %arg5: memref<8x32xf32, #tpu.memory_space<vmem>>, %arg6: memref<2x32x16xbf16, #tpu.memory_space<vmem>>, %arg7: memref<2x32x16xbf16, #tpu.memory_space<vmem>>, %arg8: memref<2x32x16xbf16, #tpu.memory_space<vmem>>, %arg9: memref<2x16x32xbf16, #tpu.memory_space<vmem>>, %arg10: memref<1x32xf32, #tpu.memory_space<vmem>>, %arg11: memref<1x32xf32, #tpu.memory_space<vmem>>, %arg12: memref<8x32xf32, #tpu.memory_space<vmem>>, %arg13: memref<2x8x1xf32, #tpu.memory_space<vmem>>, %arg14: memref<2x8x1xf32, #tpu.memory_space<vmem>>, %arg15: memref<2x8x16xf32, #tpu.memory_space<vmem>>) attributes {dimension_semantics = [#tpu.dimension_semantics<parallel>, #tpu.dimension_semantics<arbitrary>], iteration_bounds = array<i64: 2, 2>, scalar_prefetch = 0 : i64, scratch_operands = 3 : i64, tpu.core_type = #tpu.core_type<tc>, window_params = [{transform_indices = @transform_0, window_bounds = array<i64: 8, 1>}, {transform_indices = @transform_1, window_bounds = array<i64: 8, 1>}, {transform_indices = @transform_2, window_bounds = array<i64: 8, 32>}, {transform_indices = @transform_3, window_bounds = array<i64: 8, 32>}, {pipeline_mode = #tpu.pipeline_mode<synchronous>, transform_indices = @transform_4, window_bounds = array<i64: 2, 32, 16>}, {pipeline_mode = #tpu.pipeline_mode<synchronous>, transform_indices = @transform_5, window_bounds = array<i64: 2, 32, 16>}, {pipeline_mode = #tpu.pipeline_mode<synchronous>, transform_indices = @transform_6, window_bounds = array<i64: 2, 32, 16>}, {pipeline_mode = #tpu.pipeline_mode<synchronous>, transform_indices = @transform_7, window_bounds = array<i64: 2, 16, 32>}, {pipeline_mode = #tpu.pipeline_mode<synchronous>, transform_indices = @transform_8, window_bounds = array<i64: 1, 32>}, {pipeline_mode = #tpu.pipeline_mode<synchronous>, transform_indices = @transform_9, window_bounds = array<i64: 1, 32>}, {transform_indices = @transform_10, window_bounds = array<i64: 8, 32>}]} {
    %c0 = arith.constant 0 : index
    %c0_0 = arith.constant 0 : index
    %0 = vector.load %arg4[%c0, %c0_0] : memref<8x32xf32, #tpu.memory_space<vmem>>, vector<8x32xf32>
    %c0_1 = arith.constant 0 : index
    %c0_2 = arith.constant 0 : index
    %1 = vector.load %arg5[%c0_1, %c0_2] : memref<8x32xf32, #tpu.memory_space<vmem>>, vector<8x32xf32>
    %c0_3 = arith.constant 0 : index
    %c0_4 = arith.constant 0 : index
    %2 = vector.load %arg2[%c0_3, %c0_4] : memref<8x1xi32, #tpu.memory_space<vmem>>, vector<8x1xi32>
    %c0_5 = arith.constant 0 : index
    %c0_6 = arith.constant 0 : index
    %3 = vector.load %arg3[%c0_5, %c0_6] : memref<8x1xi32, #tpu.memory_space<vmem>>, vector<8x1xi32>
    %c0_i32 = arith.constant 0 : i32
    %4 = arith.cmpi eq, %arg1, %c0_i32 : i32
    %5 = arith.extui %4 : i1 to i32
    %c0_i32_7 = arith.constant 0 : i32
    %6 = arith.cmpi ne, %5, %c0_i32_7 : i32
    scf.if %6 {
      %cst_79 = arith.constant -1.000000e+30 : f32
      %121 = vector.broadcast %cst_79 : f32 to vector<2x8x1xf32>
      %c0_80 = arith.constant 0 : index
      %c0_81 = arith.constant 0 : index
      %c0_82 = arith.constant 0 : index
      %122 = vector.load %arg13[%c0_80, %c0_81, %c0_82] : memref<2x8x1xf32, #tpu.memory_space<vmem>>, vector<2x8x1xf32>
      tpu.vector_store %arg13[%c0_80, %c0_81, %c0_82], %121 {strides = array<i32>} : memref<2x8x1xf32, #tpu.memory_space<vmem>>, vector<2x8x1xf32>,
      %cst_83 = arith.constant 0.000000e+00 : f32
      %123 = vector.broadcast %cst_83 : f32 to vector<2x8x1xf32>
      %c0_84 = arith.constant 0 : index
      %c0_85 = arith.constant 0 : index
      %c0_86 = arith.constant 0 : index
      %124 = vector.load %arg14[%c0_84, %c0_85, %c0_86] : memref<2x8x1xf32, #tpu.memory_space<vmem>>, vector<2x8x1xf32>
      tpu.vector_store %arg14[%c0_84, %c0_85, %c0_86], %123 {strides = array<i32>} : memref<2x8x1xf32, #tpu.memory_space<vmem>>, vector<2x8x1xf32>,
      %cst_87 = arith.constant 0.000000e+00 : f32
      %125 = vector.broadcast %cst_87 : f32 to vector<2x8x16xf32>
      %c0_88 = arith.constant 0 : index
      %c0_89 = arith.constant 0 : index
      %c0_90 = arith.constant 0 : index
      %126 = vector.load %arg15[%c0_88, %c0_89, %c0_90] : memref<2x8x16xf32, #tpu.memory_space<vmem>>, vector<2x8x16xf32>
      tpu.vector_store %arg15[%c0_88, %c0_89, %c0_90], %125 {strides = array<i32>} : memref<2x8x16xf32, #tpu.memory_space<vmem>>, vector<2x8x16xf32>,
    } else {
    }
    %7 = tpu.iota {dimensions = array<i32: 1>} : vector<8x8xi32>
    %c8_i32 = arith.constant 8 : i32
    %8 = arith.muli %arg1, %c8_i32 : i32
    %9 = vector.broadcast %8 : i32 to vector<8x8xi32>
    %10 = arith.addi %7, %9 : vector<8x8xi32>
    %11 = vector.broadcast %2 : vector<8x1xi32> to vector<8x8xi32>
    %12 = arith.cmpi sge, %10, %11 : vector<8x8xi32>
    %13 = vector.broadcast %3 : vector<8x1xi32> to vector<8x8xi32>
    %14 = arith.cmpi slt, %10, %13 : vector<8x8xi32>
    %15 = arith.andi %12, %14 : vector<8x8xi1>
    %cst = arith.constant 0.000000e+00 : f32
    %cst_8 = arith.constant -1.000000e+30 : f32
    %16 = vector.broadcast %cst : f32 to vector<8x8xf32>
    %17 = vector.broadcast %cst_8 : f32 to vector<8x8xf32>
    %18 = arith.select %15, %16, %17 : vector<8x8xi1>, vector<8x8xf32>
    %19 = arith.truncf %0 : vector<8x32xf32> to vector<8x32xbf16>
    %20 = arith.truncf %1 : vector<8x32xf32> to vector<8x32xbf16>
    %21 = arith.truncf %1 : vector<8x32xf32> to vector<8x32xbf16>
    %c0_9 = arith.constant 0 : index
    %c0_10 = arith.constant 0 : index
    %c0_11 = arith.constant 0 : index
    %22 = vector.load %arg6[%c0_9, %c0_10, %c0_11] : memref<2x32x16xbf16, #tpu.memory_space<vmem>>, vector<1x32x16xbf16>
    %23 = vector.shape_cast %22 : vector<1x32x16xbf16> to vector<32x16xbf16>
    %cst_12 = arith.constant dense<0.000000e+00> : vector<8x16xf32>
    %24 = tpu.matmul %19, %23, %cst_12 {dimension_numbers = #tpu.dot_dimension_numbers<[1], [0], [0], [1], [0, 0, 1, 1], [], []>} : vector<8x32xbf16>, vector<32x16xbf16>, vector<8x16xf32> -> vector<8x16xf32>
    %c0_13 = arith.constant 0 : index
    %c0_14 = arith.constant 0 : index
    %c0_15 = arith.constant 0 : index
    %25 = vector.load %arg7[%c0_13, %c0_14, %c0_15] : memref<2x32x16xbf16, #tpu.memory_space<vmem>>, vector<1x32x16xbf16>
    %26 = vector.shape_cast %25 : vector<1x32x16xbf16> to vector<32x16xbf16>
    %cst_16 = arith.constant dense<0.000000e+00> : vector<8x16xf32>
    %27 = tpu.matmul %20, %26, %cst_16 {dimension_numbers = #tpu.dot_dimension_numbers<[1], [0], [0], [1], [0, 0, 1, 1], [], []>} : vector<8x32xbf16>, vector<32x16xbf16>, vector<8x16xf32> -> vector<8x16xf32>
    %c0_17 = arith.constant 0 : index
    %c0_18 = arith.constant 0 : index
    %c0_19 = arith.constant 0 : index
    %28 = vector.load %arg8[%c0_17, %c0_18, %c0_19] : memref<2x32x16xbf16, #tpu.memory_space<vmem>>, vector<1x32x16xbf16>
    %29 = vector.shape_cast %28 : vector<1x32x16xbf16> to vector<32x16xbf16>
    %cst_20 = arith.constant dense<0.000000e+00> : vector<8x16xf32>
    %30 = tpu.matmul %21, %29, %cst_20 {dimension_numbers = #tpu.dot_dimension_numbers<[1], [0], [0], [1], [0, 0, 1, 1], [], []>} : vector<8x32xbf16>, vector<32x16xbf16>, vector<8x16xf32> -> vector<8x16xf32>
    %31 = arith.truncf %24 : vector<8x16xf32> to vector<8x16xbf16>
    %32 = arith.truncf %27 : vector<8x16xf32> to vector<8x16xbf16>
    %cst_21 = arith.constant dense<0.000000e+00> : vector<8x8xf32>
    %33 = tpu.matmul %31, %32, %cst_21 {dimension_numbers = #tpu.dot_dimension_numbers<[1], [1], [0], [0], [0, 0, 1, 0], [], []>} : vector<8x16xbf16>, vector<8x16xbf16>, vector<8x8xf32> -> vector<8x8xf32>
    %cst_22 = arith.constant 0.176776692 : f32
    %34 = vector.broadcast %cst_22 : f32 to vector<8x8xf32>
    %35 = arith.mulf %33, %34 : vector<8x8xf32>
    %36 = arith.addf %35, %18 : vector<8x8xf32>
    %c0_23 = arith.constant 0 : index
    %c0_24 = arith.constant 0 : index
    %c0_25 = arith.constant 0 : index
    %37 = vector.load %arg13[%c0_23, %c0_24, %c0_25] : memref<2x8x1xf32, #tpu.memory_space<vmem>>, vector<1x8x1xf32>
    %38 = vector.shape_cast %37 : vector<1x8x1xf32> to vector<8x1xf32>
    %cst_26 = arith.constant dense<0xFF800000> : vector<8xf32>
    %39 = vector.multi_reduction <maximumf>, %36, %cst_26 [1] : vector<8x8xf32> to vector<8xf32>
    %40 = vector.shape_cast %39 : vector<8xf32> to vector<8x1xf32>
    %41 = arith.maximumf %38, %40 : vector<8x1xf32>
    %42 = arith.subf %38, %41 : vector<8x1xf32>
    %43 = math.exp %42 : vector<8x1xf32>
    %44 = vector.broadcast %41 : vector<8x1xf32> to vector<8x8xf32>
    %45 = arith.subf %36, %44 : vector<8x8xf32>
    %46 = math.exp %45 : vector<8x8xf32>
    %c0_27 = arith.constant 0 : index
    %c0_28 = arith.constant 0 : index
    %c0_29 = arith.constant 0 : index
    %47 = vector.load %arg14[%c0_27, %c0_28, %c0_29] : memref<2x8x1xf32, #tpu.memory_space<vmem>>, vector<1x8x1xf32>
    %48 = vector.shape_cast %47 : vector<1x8x1xf32> to vector<8x1xf32>
    %49 = arith.mulf %43, %48 : vector<8x1xf32>
    %cst_30 = arith.constant dense<0.000000e+00> : vector<8xf32>
    %50 = vector.multi_reduction <add>, %46, %cst_30 [1] : vector<8x8xf32> to vector<8xf32>
    %51 = vector.shape_cast %50 : vector<8xf32> to vector<8x1xf32>
    %52 = arith.addf %49, %51 : vector<8x1xf32>
    %c0_31 = arith.constant 0 : index
    %c0_32 = arith.constant 0 : index
    %c0_33 = arith.constant 0 : index
    %53 = vector.load %arg14[%c0_31, %c0_32, %c0_33] : memref<2x8x1xf32, #tpu.memory_space<vmem>>, vector<1x8x1xf32>
    %54 = vector.shape_cast %53 : vector<1x8x1xf32> to vector<8x1xf32>
    %55 = vector.shape_cast %52 : vector<8x1xf32> to vector<1x8x1xf32>
    tpu.vector_store %arg14[%c0_31, %c0_32, %c0_33], %55 {strides = array<i32>} : memref<2x8x1xf32, #tpu.memory_space<vmem>>, vector<1x8x1xf32>,
    %c0_34 = arith.constant 0 : index
    %c0_35 = arith.constant 0 : index
    %c0_36 = arith.constant 0 : index
    %56 = vector.load %arg15[%c0_34, %c0_35, %c0_36] : memref<2x8x16xf32, #tpu.memory_space<vmem>>, vector<1x8x16xf32>
    %57 = vector.shape_cast %56 : vector<1x8x16xf32> to vector<8x16xf32>
    %58 = vector.broadcast %43 : vector<8x1xf32> to vector<8x16xf32>
    %59 = arith.mulf %58, %57 : vector<8x16xf32>
    %60 = arith.truncf %46 : vector<8x8xf32> to vector<8x8xbf16>
    %61 = arith.truncf %30 : vector<8x16xf32> to vector<8x16xbf16>
    %cst_37 = arith.constant dense<0.000000e+00> : vector<8x16xf32>
    %62 = tpu.matmul %60, %61, %cst_37 {dimension_numbers = #tpu.dot_dimension_numbers<[1], [0], [0], [1], [0, 0, 1, 1], [], []>} : vector<8x8xbf16>, vector<8x16xbf16>, vector<8x16xf32> -> vector<8x16xf32>
    %63 = arith.addf %59, %62 : vector<8x16xf32>
    %c0_38 = arith.constant 0 : index
    %c0_39 = arith.constant 0 : index
    %c0_40 = arith.constant 0 : index
    %64 = vector.load %arg15[%c0_38, %c0_39, %c0_40] : memref<2x8x16xf32, #tpu.memory_space<vmem>>, vector<1x8x16xf32>
    %65 = vector.shape_cast %64 : vector<1x8x16xf32> to vector<8x16xf32>
    %66 = vector.shape_cast %63 : vector<8x16xf32> to vector<1x8x16xf32>
    tpu.vector_store %arg15[%c0_38, %c0_39, %c0_40], %66 {strides = array<i32>} : memref<2x8x16xf32, #tpu.memory_space<vmem>>, vector<1x8x16xf32>,
    %c0_41 = arith.constant 0 : index
    %c0_42 = arith.constant 0 : index
    %c0_43 = arith.constant 0 : index
    %67 = vector.load %arg13[%c0_41, %c0_42, %c0_43] : memref<2x8x1xf32, #tpu.memory_space<vmem>>, vector<1x8x1xf32>
    %68 = vector.shape_cast %67 : vector<1x8x1xf32> to vector<8x1xf32>
    %69 = vector.shape_cast %41 : vector<8x1xf32> to vector<1x8x1xf32>
    tpu.vector_store %arg13[%c0_41, %c0_42, %c0_43], %69 {strides = array<i32>} : memref<2x8x1xf32, #tpu.memory_space<vmem>>, vector<1x8x1xf32>,
    %c1 = arith.constant 1 : index
    %c0_44 = arith.constant 0 : index
    %c0_45 = arith.constant 0 : index
    %70 = vector.load %arg6[%c1, %c0_44, %c0_45] : memref<2x32x16xbf16, #tpu.memory_space<vmem>>, vector<1x32x16xbf16>
    %71 = vector.shape_cast %70 : vector<1x32x16xbf16> to vector<32x16xbf16>
    %cst_46 = arith.constant dense<0.000000e+00> : vector<8x16xf32>
    %72 = tpu.matmul %19, %71, %cst_46 {dimension_numbers = #tpu.dot_dimension_numbers<[1], [0], [0], [1], [0, 0, 1, 1], [], []>} : vector<8x32xbf16>, vector<32x16xbf16>, vector<8x16xf32> -> vector<8x16xf32>
    %c1_47 = arith.constant 1 : index
    %c0_48 = arith.constant 0 : index
    %c0_49 = arith.constant 0 : index
    %73 = vector.load %arg7[%c1_47, %c0_48, %c0_49] : memref<2x32x16xbf16, #tpu.memory_space<vmem>>, vector<1x32x16xbf16>
    %74 = vector.shape_cast %73 : vector<1x32x16xbf16> to vector<32x16xbf16>
    %cst_50 = arith.constant dense<0.000000e+00> : vector<8x16xf32>
    %75 = tpu.matmul %20, %74, %cst_50 {dimension_numbers = #tpu.dot_dimension_numbers<[1], [0], [0], [1], [0, 0, 1, 1], [], []>} : vector<8x32xbf16>, vector<32x16xbf16>, vector<8x16xf32> -> vector<8x16xf32>
    %c1_51 = arith.constant 1 : index
    %c0_52 = arith.constant 0 : index
    %c0_53 = arith.constant 0 : index
    %76 = vector.load %arg8[%c1_51, %c0_52, %c0_53] : memref<2x32x16xbf16, #tpu.memory_space<vmem>>, vector<1x32x16xbf16>
    %77 = vector.shape_cast %76 : vector<1x32x16xbf16> to vector<32x16xbf16>
    %cst_54 = arith.constant dense<0.000000e+00> : vector<8x16xf32>
    %78 = tpu.matmul %21, %77, %cst_54 {dimension_numbers = #tpu.dot_dimension_numbers<[1], [0], [0], [1], [0, 0, 1, 1], [], []>} : vector<8x32xbf16>, vector<32x16xbf16>, vector<8x16xf32> -> vector<8x16xf32>
    %79 = arith.truncf %72 : vector<8x16xf32> to vector<8x16xbf16>
    %80 = arith.truncf %75 : vector<8x16xf32> to vector<8x16xbf16>
    %cst_55 = arith.constant dense<0.000000e+00> : vector<8x8xf32>
    %81 = tpu.matmul %79, %80, %cst_55 {dimension_numbers = #tpu.dot_dimension_numbers<[1], [1], [0], [0], [0, 0, 1, 0], [], []>} : vector<8x16xbf16>, vector<8x16xbf16>, vector<8x8xf32> -> vector<8x8xf32>
    %cst_56 = arith.constant 0.176776692 : f32
    %82 = vector.broadcast %cst_56 : f32 to vector<8x8xf32>
    %83 = arith.mulf %81, %82 : vector<8x8xf32>
    %84 = arith.addf %83, %18 : vector<8x8xf32>
    %c1_57 = arith.constant 1 : index
    %c0_58 = arith.constant 0 : index
    %c0_59 = arith.constant 0 : index
    %85 = vector.load %arg13[%c1_57, %c0_58, %c0_59] : memref<2x8x1xf32, #tpu.memory_space<vmem>>, vector<1x8x1xf32>
    %86 = vector.shape_cast %85 : vector<1x8x1xf32> to vector<8x1xf32>
    %cst_60 = arith.constant dense<0xFF800000> : vector<8xf32>
    %87 = vector.multi_reduction <maximumf>, %84, %cst_60 [1] : vector<8x8xf32> to vector<8xf32>
    %88 = vector.shape_cast %87 : vector<8xf32> to vector<8x1xf32>
    %89 = arith.maximumf %86, %88 : vector<8x1xf32>
    %90 = arith.subf %86, %89 : vector<8x1xf32>
    %91 = math.exp %90 : vector<8x1xf32>
    %92 = vector.broadcast %89 : vector<8x1xf32> to vector<8x8xf32>
    %93 = arith.subf %84, %92 : vector<8x8xf32>
    %94 = math.exp %93 : vector<8x8xf32>
    %c1_61 = arith.constant 1 : index
    %c0_62 = arith.constant 0 : index
    %c0_63 = arith.constant 0 : index
    %95 = vector.load %arg14[%c1_61, %c0_62, %c0_63] : memref<2x8x1xf32, #tpu.memory_space<vmem>>, vector<1x8x1xf32>
    %96 = vector.shape_cast %95 : vector<1x8x1xf32> to vector<8x1xf32>
    %97 = arith.mulf %91, %96 : vector<8x1xf32>
    %cst_64 = arith.constant dense<0.000000e+00> : vector<8xf32>
    %98 = vector.multi_reduction <add>, %94, %cst_64 [1] : vector<8x8xf32> to vector<8xf32>
    %99 = vector.shape_cast %98 : vector<8xf32> to vector<8x1xf32>
    %100 = arith.addf %97, %99 : vector<8x1xf32>
    %c1_65 = arith.constant 1 : index
    %c0_66 = arith.constant 0 : index
    %c0_67 = arith.constant 0 : index
    %101 = vector.load %arg14[%c1_65, %c0_66, %c0_67] : memref<2x8x1xf32, #tpu.memory_space<vmem>>, vector<1x8x1xf32>
    %102 = vector.shape_cast %101 : vector<1x8x1xf32> to vector<8x1xf32>
    %103 = vector.shape_cast %100 : vector<8x1xf32> to vector<1x8x1xf32>
    tpu.vector_store %arg14[%c1_65, %c0_66, %c0_67], %103 {strides = array<i32>} : memref<2x8x1xf32, #tpu.memory_space<vmem>>, vector<1x8x1xf32>,
    %c1_68 = arith.constant 1 : index
    %c0_69 = arith.constant 0 : index
    %c0_70 = arith.constant 0 : index
    %104 = vector.load %arg15[%c1_68, %c0_69, %c0_70] : memref<2x8x16xf32, #tpu.memory_space<vmem>>, vector<1x8x16xf32>
    %105 = vector.shape_cast %104 : vector<1x8x16xf32> to vector<8x16xf32>
    %106 = vector.broadcast %91 : vector<8x1xf32> to vector<8x16xf32>
    %107 = arith.mulf %106, %105 : vector<8x16xf32>
    %108 = arith.truncf %94 : vector<8x8xf32> to vector<8x8xbf16>
    %109 = arith.truncf %78 : vector<8x16xf32> to vector<8x16xbf16>
    %cst_71 = arith.constant dense<0.000000e+00> : vector<8x16xf32>
    %110 = tpu.matmul %108, %109, %cst_71 {dimension_numbers = #tpu.dot_dimension_numbers<[1], [0], [0], [1], [0, 0, 1, 1], [], []>} : vector<8x8xbf16>, vector<8x16xbf16>, vector<8x16xf32> -> vector<8x16xf32>
    %111 = arith.addf %107, %110 : vector<8x16xf32>
    %c1_72 = arith.constant 1 : index
    %c0_73 = arith.constant 0 : index
    %c0_74 = arith.constant 0 : index
    %112 = vector.load %arg15[%c1_72, %c0_73, %c0_74] : memref<2x8x16xf32, #tpu.memory_space<vmem>>, vector<1x8x16xf32>
    %113 = vector.shape_cast %112 : vector<1x8x16xf32> to vector<8x16xf32>
    %114 = vector.shape_cast %111 : vector<8x16xf32> to vector<1x8x16xf32>
    tpu.vector_store %arg15[%c1_72, %c0_73, %c0_74], %114 {strides = array<i32>} : memref<2x8x16xf32, #tpu.memory_space<vmem>>, vector<1x8x16xf32>,
    %c1_75 = arith.constant 1 : index
    %c0_76 = arith.constant 0 : index
    %c0_77 = arith.constant 0 : index
    %115 = vector.load %arg13[%c1_75, %c0_76, %c0_77] : memref<2x8x1xf32, #tpu.memory_space<vmem>>, vector<1x8x1xf32>
    %116 = vector.shape_cast %115 : vector<1x8x1xf32> to vector<8x1xf32>
    %117 = vector.shape_cast %89 : vector<8x1xf32> to vector<1x8x1xf32>
    tpu.vector_store %arg13[%c1_75, %c0_76, %c0_77], %117 {strides = array<i32>} : memref<2x8x1xf32, #tpu.memory_space<vmem>>, vector<1x8x1xf32>,
    %c1_i32 = arith.constant 1 : i32
    %118 = arith.cmpi eq, %arg1, %c1_i32 : i32
    %119 = arith.extui %118 : i1 to i32
    %c0_i32_78 = arith.constant 0 : i32
    %120 = arith.cmpi ne, %119, %c0_i32_78 : i32
    scf.if %120 {
      %c0_79 = arith.constant 0 : index
      %c0_80 = arith.constant 0 : index
      %c0_81 = arith.constant 0 : index
      %121 = vector.load %arg15[%c0_79, %c0_80, %c0_81] : memref<2x8x16xf32, #tpu.memory_space<vmem>>, vector<1x8x16xf32>
      %122 = vector.shape_cast %121 : vector<1x8x16xf32> to vector<8x16xf32>
      %c0_82 = arith.constant 0 : index
      %c0_83 = arith.constant 0 : index
      %c0_84 = arith.constant 0 : index
      %123 = vector.load %arg14[%c0_82, %c0_83, %c0_84] : memref<2x8x1xf32, #tpu.memory_space<vmem>>, vector<1x8x1xf32>
      %124 = vector.shape_cast %123 : vector<1x8x1xf32> to vector<8x1xf32>
      %125 = tpu.reciprocal %124 {approx = true} : vector<8x1xf32> -> vector<8x1xf32>
      %126 = vector.broadcast %125 : vector<8x1xf32> to vector<8x16xf32>
      %127 = arith.mulf %122, %126 : vector<8x16xf32>
      %128 = arith.truncf %127 : vector<8x16xf32> to vector<8x16xbf16>
      %c0_85 = arith.constant 0 : index
      %c0_86 = arith.constant 0 : index
      %c0_87 = arith.constant 0 : index
      %129 = vector.load %arg9[%c0_85, %c0_86, %c0_87] : memref<2x16x32xbf16, #tpu.memory_space<vmem>>, vector<1x16x32xbf16>
      %130 = vector.shape_cast %129 : vector<1x16x32xbf16> to vector<16x32xbf16>
      %cst_88 = arith.constant dense<0.000000e+00> : vector<8x32xf32>
      %131 = tpu.matmul %128, %130, %cst_88 {dimension_numbers = #tpu.dot_dimension_numbers<[1], [0], [0], [1], [0, 0, 1, 1], [], []>} : vector<8x16xbf16>, vector<16x32xbf16>, vector<8x32xf32> -> vector<8x32xf32>
      %132 = arith.addf %0, %131 : vector<8x32xf32>
      %c1_89 = arith.constant 1 : index
      %c0_90 = arith.constant 0 : index
      %c0_91 = arith.constant 0 : index
      %133 = vector.load %arg15[%c1_89, %c0_90, %c0_91] : memref<2x8x16xf32, #tpu.memory_space<vmem>>, vector<1x8x16xf32>
      %134 = vector.shape_cast %133 : vector<1x8x16xf32> to vector<8x16xf32>
      %c1_92 = arith.constant 1 : index
      %c0_93 = arith.constant 0 : index
      %c0_94 = arith.constant 0 : index
      %135 = vector.load %arg14[%c1_92, %c0_93, %c0_94] : memref<2x8x1xf32, #tpu.memory_space<vmem>>, vector<1x8x1xf32>
      %136 = vector.shape_cast %135 : vector<1x8x1xf32> to vector<8x1xf32>
      %137 = tpu.reciprocal %136 {approx = true} : vector<8x1xf32> -> vector<8x1xf32>
      %138 = vector.broadcast %137 : vector<8x1xf32> to vector<8x16xf32>
      %139 = arith.mulf %134, %138 : vector<8x16xf32>
      %140 = arith.truncf %139 : vector<8x16xf32> to vector<8x16xbf16>
      %c1_95 = arith.constant 1 : index
      %c0_96 = arith.constant 0 : index
      %c0_97 = arith.constant 0 : index
      %141 = vector.load %arg9[%c1_95, %c0_96, %c0_97] : memref<2x16x32xbf16, #tpu.memory_space<vmem>>, vector<1x16x32xbf16>
      %142 = vector.shape_cast %141 : vector<1x16x32xbf16> to vector<16x32xbf16>
      %cst_98 = arith.constant dense<0.000000e+00> : vector<8x32xf32>
      %143 = tpu.matmul %140, %142, %cst_98 {dimension_numbers = #tpu.dot_dimension_numbers<[1], [0], [0], [1], [0, 0, 1, 1], [], []>} : vector<8x16xbf16>, vector<16x32xbf16>, vector<8x32xf32> -> vector<8x32xf32>
      %144 = arith.addf %132, %143 : vector<8x32xf32>
      %c0_99 = arith.constant 0 : index
      %c0_100 = arith.constant 0 : index
      %145 = vector.load %arg10[%c0_99, %c0_100] : memref<1x32xf32, #tpu.memory_space<vmem>>, vector<1x32xf32>
      %c0_101 = arith.constant 0 : index
      %c0_102 = arith.constant 0 : index
      %146 = vector.load %arg11[%c0_101, %c0_102] : memref<1x32xf32, #tpu.memory_space<vmem>>, vector<1x32xf32>
      %cst_103 = arith.constant dense<0.000000e+00> : vector<8xf32>
      %147 = vector.multi_reduction <add>, %144, %cst_103 [1] : vector<8x32xf32> to vector<8xf32>
      %148 = vector.shape_cast %147 : vector<8xf32> to vector<8x1xf32>
      %cst_104 = arith.constant 3.200000e+01 : f32
      %149 = vector.broadcast %cst_104 : f32 to vector<8x1xf32>
      %150 = arith.divf %148, %149 : vector<8x1xf32>
      %151 = vector.broadcast %150 : vector<8x1xf32> to vector<8x32xf32>
      %152 = arith.subf %144, %151 : vector<8x32xf32>
      %153 = arith.mulf %152, %152 : vector<8x32xf32>
      %cst_105 = arith.constant dense<0.000000e+00> : vector<8xf32>
      %154 = vector.multi_reduction <add>, %153, %cst_105 [1] : vector<8x32xf32> to vector<8xf32>
      %155 = vector.shape_cast %154 : vector<8xf32> to vector<8x1xf32>
      %cst_106 = arith.constant 3.100000e+01 : f32
      %156 = vector.broadcast %cst_106 : f32 to vector<8x1xf32>
      %157 = arith.divf %155, %156 : vector<8x1xf32>
      %158 = math.sqrt %157 : vector<8x1xf32>
      %cst_107 = arith.constant 1.000000e-03 : f32
      %159 = vector.broadcast %cst_107 : f32 to vector<8x1xf32>
      %160 = arith.addf %158, %159 : vector<8x1xf32>
      %161 = vector.broadcast %160 : vector<8x1xf32> to vector<8x32xf32>
      %162 = arith.divf %152, %161 : vector<8x32xf32>
      %163 = vector.broadcast %145 : vector<1x32xf32> to vector<8x32xf32>
      %164 = arith.mulf %162, %163 : vector<8x32xf32>
      %165 = vector.broadcast %146 : vector<1x32xf32> to vector<8x32xf32>
      %166 = arith.addf %164, %165 : vector<8x32xf32>
      %c0_108 = arith.constant 0 : index
      %c0_109 = arith.constant 0 : index
      %167 = vector.load %arg12[%c0_108, %c0_109] : memref<8x32xf32, #tpu.memory_space<vmem>>, vector<8x32xf32>
      tpu.vector_store %arg12[%c0_108, %c0_109], %166 {strides = array<i32>} : memref<8x32xf32, #tpu.memory_space<vmem>>, vector<8x32xf32>,
    } else {
    }
    return
  }
  func.func @transform_0(%arg0: i32, %arg1: i32) -> (i32, i32) {
    %c0_i32 = arith.constant 0 : i32
    %c0_i32_0 = arith.constant 0 : i32
    return %arg0, %c0_i32 : i32, i32
  }
  func.func @transform_1(%arg0: i32, %arg1: i32) -> (i32, i32) {
    %c0_i32 = arith.constant 0 : i32
    %c0_i32_0 = arith.constant 0 : i32
    return %arg0, %c0_i32 : i32, i32
  }
  func.func @transform_2(%arg0: i32, %arg1: i32) -> (i32, i32) {
    %c0_i32 = arith.constant 0 : i32
    %c0_i32_0 = arith.constant 0 : i32
    return %arg0, %c0_i32 : i32, i32
  }
  func.func @transform_3(%arg0: i32, %arg1: i32) -> (i32, i32) {
    %c0_i32 = arith.constant 0 : i32
    %c0_i32_0 = arith.constant 0 : i32
    return %arg1, %c0_i32 : i32, i32
  }
  func.func @transform_4(%arg0: i32, %arg1: i32) -> (i32, i32, i32) {
    %c0_i32 = arith.constant 0 : i32
    %c0_i32_0 = arith.constant 0 : i32
    %c0_i32_1 = arith.constant 0 : i32
    %c0_i32_2 = arith.constant 0 : i32
    return %c0_i32, %c0_i32_0, %c0_i32_1 : i32, i32, i32
  }
  func.func @transform_5(%arg0: i32, %arg1: i32) -> (i32, i32, i32) {
    %c0_i32 = arith.constant 0 : i32
    %c0_i32_0 = arith.constant 0 : i32
    %c0_i32_1 = arith.constant 0 : i32
    %c0_i32_2 = arith.constant 0 : i32
    return %c0_i32, %c0_i32_0, %c0_i32_1 : i32, i32, i32
  }
  func.func @transform_6(%arg0: i32, %arg1: i32) -> (i32, i32, i32) {
    %c0_i32 = arith.constant 0 : i32
    %c0_i32_0 = arith.constant 0 : i32
    %c0_i32_1 = arith.constant 0 : i32
    %c0_i32_2 = arith.constant 0 : i32
    return %c0_i32, %c0_i32_0, %c0_i32_1 : i32, i32, i32
  }
  func.func @transform_7(%arg0: i32, %arg1: i32) -> (i32, i32, i32) {
    %c0_i32 = arith.constant 0 : i32
    %c0_i32_0 = arith.constant 0 : i32
    %c0_i32_1 = arith.constant 0 : i32
    %c0_i32_2 = arith.constant 0 : i32
    return %c0_i32, %c0_i32_0, %c0_i32_1 : i32, i32, i32
  }
  func.func @transform_8(%arg0: i32, %arg1: i32) -> (i32, i32) {
    %c0_i32 = arith.constant 0 : i32
    %c0_i32_0 = arith.constant 0 : i32
    %c0_i32_1 = arith.constant 0 : i32
    return %c0_i32, %c0_i32_0 : i32, i32
  }
  func.func @transform_9(%arg0: i32, %arg1: i32) -> (i32, i32) {
    %c0_i32 = arith.constant 0 : i32
    %c0_i32_0 = arith.constant 0 : i32
    %c0_i32_1 = arith.constant 0 : i32
    return %c0_i32, %c0_i32_0 : i32, i32
  }
  func.func @transform_10(%arg0: i32, %arg1: i32) -> (i32, i32) {
    %c0_i32 = arith.constant 0 : i32
    %c0_i32_0 = arith.constant 0 : i32
    return %arg0, %c0_i32 : i32, i32
  }
}

</mosaic_0001>

<bundles_post_ra>
// kernel: tpu_custom_call.1
= control target key start
LH: loop header
LB: loop body
LE: loop exit
PB: predicated region body
PF: predicated region fallthrough
CT: control target
= control target key end

     0   :  { %s2091_s0 = inlined_call_operand.vmem [shape: s32[16,1], index: 0, kind: input, shape index: {}]   ;;  %s2092_s1 = inlined_call_operand.vmem [shape: s32[16,1], index: 1, kind: input, shape index: {}]   ;;  %s2093_s2 = inlined_call_operand.vmem [shape: f32[16,32], index: 2, kind: input, shape index: {}]   ;;  %s2094_s3 = inlined_call_operand.vmem [shape: f32[16,32], index: 3, kind: input, shape index: {}]   ;;  %s2095_s4 = inlined_call_operand.vmem [shape: bf16[2,32,16], index: 4, kind: input, shape index: {}]   ;;  %s2096_s5 = inlined_call_operand.vmem [shape: bf16[2,32,16], index: 5, kind: input, shape index: {}]   ;;  %s2097_s6 = inlined_call_operand.vmem [shape: bf16[2,32,16], index: 6, kind: input, shape index: {}]   ;;  %s2098_s7 = inlined_call_operand.vmem [shape: bf16[2,16,32], index: 7, kind: input, shape index: {}]   ;;  %s2099_s8 = inlined_call_operand.vmem [shape: f32[1,32], index: 8, kind: input, shape index: {}]   ;;  %s2100_s9 = inlined_call_operand.vmem [shape: f32[1,32], index: 9, kind: input, shape index: {}]   ;;  %s2101_s10 = inlined_call_operand.hbm [shape: f32[16,32], index: 10, kind: output, shape index: {}]  }
   0x1   :  { %2112 = sst [smem:[#allocation17_spill]] %s2101_s10 }
   0x2   :  { %15 = vsyncpa [#allocation6], 0 }
   0x3   :  { %17 = vsyncpa [#allocation6 + $0x1], 0  ;;  %s1800_s13 = smov 0   ;;  %s1802_s14 = smov 0  }
   0x4   :  { %s1804_s15 = smov 0   ;;  %s1806_s16 = smov 0  }
   0x5   :  { %s1808_s17 = smov 0   ;;  %s1810_s18 = smov 0  }
   0x6   :  { %s1812_s19 = smov 0   ;;  %s1814_s20 = smov 0  }
   0x7 LB: > { %2113 = sst [smem:[#allocation8_spill]] %s1705_s13  ;;  %s1355_s21 = sadd.s32 4294967295, %s1733_s20   ;;  %s1733_s20 = sphi %s1814_s20, %s23_s20   ;;  %s1729_s19 = sphi %s1812_s19, %s2135_s19   ;;  %s1725_s18 = sphi %s1810_s18, %s2134_s18   ;;  %s1721_s17 = sphi %s1808_s17, %s2133_s17   ;;  %s1717_s16 = sphi %s1806_s16, %s2132_s16   ;;  %s1713_s15 = sphi %s1804_s15, %s2131_s15   ;;  %s1709_s14 = sphi %s1802_s14, %s2137_s14   ;;  %s1705_s13 = sphi %s1800_s13, %s2136_s13  }
   0x8   : > { %2114 = sst [smem:[#allocation9_spill]] %s1713_s15  ;;  %s1356_s22 = sadd.s32 4294967294, %s1733_s20  }
   0x9   : > { %2115 = sst [smem:[#allocation10_spill]] %s1725_s18  ;;  %s32_s23 = sadd.s32 1, %s1725_s18 }
   0xa   : > { %2116 = sst [smem:[#allocation11_spill]] %s1729_s19  ;;  %p33_p0 = scmp.ge.s32.totalorder %s32_s23, 2 }
   0xb   : > { %2117 = sst [smem:[#allocation12_spill]] %s1733_s20  ;;  %s35_s24 = sadd.s32 1, %s1729_s19 }
   0xc   : > { %p282_p1 = scmp.ne.s32.totalorder %s1713_s15, %s1709_s14  ;;  %p283_p2 = scmp.eq.s32.totalorder %s1355_s21, 3 }
   0xd   : > { %s2139_s23 = smov (%p33_p0, %s32_s23), 0  ;;  %s2141_s24 = smov (!%p33_p0, %s35_s24), %s1729_s19 }
   0xe   : > { %2118 = sst [smem:[#allocation13_spill]] %s2139_s23  ;;  %p1849_p3 = por %p283_p2, %p282_p1 }
   0xf   : > { %p288_p4 = scmp.ne.s32.totalorder %s1709_s14, %s1705_s13  ;;  %p37_p5 = scmp.ge.s32.totalorder %s2141_s24, 2 }
  0x10   : > { %p289_p6 = scmp.eq.s32.totalorder %s1356_s22, 3  ;;  %p1359_p7 = scmp.ge.s32.totalorder %s1733_s20, 1 }
  0x11   : > { %p353_p8 = scmp.lt.s32.totalorder %s1733_s20, 5  ;;  %s2143_s24 = smov (%p37_p5, %s2141_s24), 0 }
  0x12   : > { %2120 = sst [smem:[#allocation14_spill]] %s2143_s24  ;;  %p1859_p9 = por %p289_p6, %p288_p4 }
  0x13   : > { %p354_p10 = pnand %p1359_p7, %p353_p8  ;;  %s269_s27 = ssub.s32 %s1729_s19, %s2143_s24 }
  0x14   : > { %s2121_s26 = scalar_select %p1859_p9, 1, 0 }
  0x15   : > { %s272_s28 = sadd.s32 1, %s1713_s15  ;;  %p270_p11 = scmp.eq.s32.totalorder %s269_s27, 0 }
  0x16   : > { %2122 = sst [smem:[#allocation15_spill]] %s2121_s26  ;;  %357 = sbr.rel (%p354_p10) target bundleno = 2322 (0x912), region = 60 }
  0x17   : > { %s1867_s29 = scalar_select %p270_p11, %s1713_s15, %s272_s28  }
  0x18   : > { %s2108_s30 = sand.u32 (!%p354_p10), 1, %s1709_s14   ;;  %p402_p12 = scmp.lt.s32.totalorder (!%p354_p10), %s1721_s17, 1 }
  0x19   : > { %2123 = sst [smem:[#allocation16_spill]] %s1867_s29  ;;  %s1873_s11 = sshll.u32 (!%p354_p10), %s2108_s30, 3 }
  0x1a   : > { %p414_p13 = scmp.lt.s32.totalorder (!%p354_p10), %s1717_s16, 1  ;;  %p1365_p0 = scmp.ne.s32.totalorder (!%p354_p10), %s1717_s16, 0 }
  0x1b   : > { %s403_s12 = scalar_select %p402_p12, %s1721_s17, 1 }
  0x1c   : > { %s415_s21 = scalar_select %p414_p13, %s1717_s16, 1 }
  0x1d   : > { %s1361_s22 = sshll.u32 %s403_s12, 3  ;;  %s401_s12 = scalar_lea.vmem [#allocation5], %s1873_s11 }
  0x1e   : > { %s405_s24 = scalar_lea.vmem %s2091_s0, %s1361_s22  ;;  %s409_s18 = scalar_lea.vmem %s2092_s1, %s1361_s22 }
  0x1f   : > { %s413_s26 = scalar_lea.vmem %s2093_s2, %s1361_s22  ;;  %s1364_s13 = sshll.u32 %s415_s21, 3  ;;  %v421_v0 = vld [vmem:[%s405_s24] sm:$0xff] }
  0x20   : > { %v422_v1 = vld [vmem:[%s409_s18] sm:$0xff]  ;;  %s417_s10 = scalar_lea.vmem %s2094_s3, %s1364_s13  ;;  %426 = sbr.rel (%p1365_p0) target bundleno = 41 (0x29), region = 64 }
  0x21   : > { %v1890_v2 = vld [vmem:[%s413_s26] sm:$0xff] }
  0x22   : > { %v420_v3 = vld [vmem:[%s417_s10] sm:$0xff] }
  0x25   : > { %vm427_vm0 = vcmask 7168   ;;  %vm432_vm1 = vcmask 130048   ;;  %v1735_v4 = vmov -1e+30   ;;  %v1736_v5 = vmov 0.0  }
  0x26   : > { %428 = vst.msk [vmem:[#allocation2] sm:$0xff] %vm427_vm0, %v1735_v4  ;;  %429 = vst.msk [vmem:[#allocation2 + $0x8] sm:$0xff] %vm427_vm0, %v1735_v4 }
  0x27   : > { %430 = vst.msk [vmem:[#allocation3] sm:$0xff] %vm427_vm0, %v1736_v5  ;;  %431 = vst.msk [vmem:[#allocation3 + $0x8] sm:$0xff] %vm427_vm0, %v1736_v5 }
  0x28   : > { %433 = vst.msk [vmem:[#allocation4] sm:$0xff] %vm432_vm1, %v1736_v5  ;;  %434 = vst.msk [vmem:[#allocation4 + $0x8] sm:$0xff] %vm432_vm1, %v1736_v5 }
  0x29 PF: > { %v1610_v6 = vld [vmem:[%s2096_s5 + $0x8] sm:$0xff]   ;;  %v1737_v7 = vmov 0.0   ;;  %v1612_v9 = vld [vmem:[%s2096_s5] sm:$0xff]   ;;  %vm1738_vm2 = vmmov 0   ;;  %vm468_vm3 = vcmask 261120   ;;  %v1914_v11 = vpack.c.bf16 %v420_v3, %v420_v3  ;;  %s1366_s22 = sshll.u32 %s1717_s16, 3 }
  0x2a   : > { %1452 = vmatprep.subr.bf16.mxu1 %v1737_v7  ;;  %1444 = vmatprep.subr.bf16.mxu0 %v1737_v7  ;;  %v1611_v8 = vld [vmem:[%s2095_s4 + $0x8] sm:$0xff]   ;;  %v1613_v10 = vld [vmem:[%s2095_s4] sm:$0xff]   ;;  %v1918_v12 = vpack.c.bf16 %v1890_v2, %v1890_v2  ;;  %v1739_v13 = vmov 0   ;;  %vm629_vm4 = vcmask 130048   ;;  %v435_v27 = vlaneseq  ;;  %v1617_v52 = vld [vmem:[%s2095_s4 + $0x18] sm:$0xff]   ;;  %p1401_p1 = scmp.ne.s32.totalorder %s1717_s16, 1 }
  0x2b   : > { %1453 = vmatpush3.bf16.msra.mxu1 %v1610_v6  ;;  %1456 = vmatprep.mubr.msk.bf16.mxu1 %vm1738_vm2, %v1737_v7  ;;  %v1614_v25 = vld [vmem:[%s2097_s6 + $0x8] sm:$0xff]   ;;  %v1615_v26 = vld [vmem:[%s2097_s6] sm:$0xff]   ;;  %v438_v30 = vstv %s1366_s22  ;;  %v1740_v35 = vmov -1e+30   ;;  %vm679_vm8 = vcmask 64512   ;;  %vm701_vm9 = vcmask 7168  }
  0x2c   : > { %1445 = vmatpush3.bf16.msra.mxu0 %v1611_v8  ;;  %1454 = vmatprep.subr.bf16.mxu1 %v1737_v7  ;;  %v436_v29 = vand.u32 127, %v435_v27  ;;  %vm715_vm10 = vcmask 1043456   ;;  %v1619_v53 = vld [vmem:[%s2095_s4 + $0x10] sm:$0xff]   ;;  %v1616_v58 = vld [vmem:[%s2096_s5 + $0x18] sm:$0xff]  }
  0x2d   : > { %1446 = vmatprep.subr.bf16.mxu0 %v1737_v7  ;;  %1448 = vmatprep.mubr.msk.bf16.mxu0 %vm1738_vm2, %v1737_v7  ;;  %v1952_v42 = vld [vmem:[#allocation2] sm:$0xff]  ;;  %v1618_v60 = vld [vmem:[%s2096_s5 + $0x10] sm:$0xff]  }
  0x2e   : > { %1608 = vset.pattern.permute.xlu0 %v1739_v13  ;;  %1609 = vset.pattern.permute.xlu1 %v1739_v13  ;;  %v439_v31 = vadd.s32 %v438_v30, %v436_v29 }
  0x2f   : > { %1455 = vmatpush3.bf16.msra.mxu1 %v1612_v9  ;;  %441 = vperm.xlu0 %1608, %v421_v0  }
  0x30   : > { %1447 = vmatpush3.bf16.msra.mxu0 %v1613_v10  ;;  %1468 = vmatprep.subr.bf16.mxu1 %v1737_v7 }
  0x31   : > { %1460 = vmatprep.subr.bf16.mxu0 %v1737_v7 }
  0x32   : > { %1457 = vmatmul.mubr.msk.bf16.vlgmr.msra.gmra.mxu1 %vm468_vm3, %v1914_v11 }
  0x33   : > { %1449 = vmatmul.mubr.msk.bf16.vlgmr.msra.gmra.mxu0 %vm468_vm3, %v1918_v12  ;;  %1470 = vmatprep.mubr.msk.bf16.mxu1 %vm1738_vm2, %v1737_v7 }
  0x34   : > { %1464 = vmatprep.mubr.msk.bf16.mxu0 %vm1738_vm2, %v1737_v7  ;;  %445 = vperm.xlu0 %1608, %v422_v1  }
  0x35   : > { %1461 = vmatpush3.bf16.msra.mxu0 %v1614_v25 }
  0x36   : > { %1462 = vmatprep.subr.bf16.mxu0 %v1737_v7 }
  0x39   : > { %1463 = vmatpush3.bf16.msra.mxu0 %v1615_v26 }
  0x3a   : > { %1474 = vmatprep.subr.bf16.mxu0 %v1737_v7 }
  0x3c   : > { %1465 = vmatmul.mubr.msk.bf16.vlgmr.msra.gmra.mxu0 %vm468_vm3, %v1914_v11 }
  0x3d   : > { %1476 = vmatprep.mubr.msk.bf16.mxu0 %vm1738_vm2, %v1737_v7 }
  0xaa   : > { %v442_v28 = vpop.permute.xlu0 %441 }
  0xab   : > { %vm443_vm5 = vcmp.ge.s32.totalorder %v439_v31, %v442_v28 }
  0xaf   : > { %v446_v32 = vpop.permute.xlu0 %445 }
  0xb0   : > { %vm447_vm6 = vcmp.lt.s32.totalorder %v439_v31, %v446_v32 }
  0xb1   : > { %vm448_vm7 = vmand %vm443_vm5, %vm447_vm6 }
  0xb2   : > { %v1948_v36 = vsel %vm448_vm7, 0.0, %v1740_v35 }
  0xf2   : > { %v565_v14 = vpop.f32.mrf.mxu1 }
  0xf3   : > { %v628_v15 = vpack.c.bf16 %v565_v14, %v565_v14  ;;  %v506_v16 = vpop.f32.mrf.mxu0 }
  0xf4   : > { %v1458_v17 = vpop.f32.mrf.mxu1  ;;  %v627_v23 = vpack.c.bf16 %v506_v16, %v506_v16  ;;  %v1621_v16 = vld [vmem:[%s2097_s6 + $0x10] sm:$0xff]  }
  0xf5   : > { %v634_v18 = vsel %vm629_vm4, %v628_v15, 0  ;;  %v1450_v19 = vpop.f32.mrf.mxu0  ;;  %v1620_v15 = vld [vmem:[%s2097_s6 + $0x18] sm:$0xff]  }
  0xf6   : > { %v568_v20 = vpop.f32.mrf.mxu1  ;;  %1469 = vmatpush3.bf16.xpose.msra.mxu1 %v634_v18 }
  0xf7   : > { %v509_v21 = vpop.f32.mrf.mxu0  ;;  %1480 = vmatprep.subr.bf16.mxu1 %v1737_v7 }
  0xf8   : > { %v1459_v22 = vpop.f32.mrf.mxu1 }
  0xf9   : > { %v1451_v24 = vpop.f32.mrf.mxu0 }
  0xfa   : > { %v984_v24 = vld [vmem:[#allocation2 + $0x8] sm:$0xff] }
  0xfc   : > { %v621_v46 = vpop.f32.mrf.mxu0 }
  0xfd   : > { %1471 = vmatmul.mubr.msk.bf16.vlgmr.msra.gmra.mxu1 %vm629_vm4, %v627_v23  ;;  %v711_v47 = vpack.c.bf16 %v621_v46, %v621_v46  ;;  %v695_v46 = vld [vmem:[#allocation3] sm:$0xff] }
  0xfe   : > { %1484 = vmatprep.mubr.msk.bf16.mxu1 %vm1738_vm2, %v1737_v7  ;;  %v1466_v48 = vpop.f32.mrf.mxu0  ;;  %1481 = vmatpush3.bf16.msra.mxu1 %v1617_v52 }
  0xff   : > { %v717_v49 = vsel %vm715_vm10, %v711_v47, 0  ;;  %1482 = vmatprep.subr.bf16.mxu1 %v1737_v7 }
 0x100   : > { %v624_v50 = vpop.f32.mrf.mxu0  ;;  %1475 = vmatpush3.bf16.msra.mxu0 %v717_v49 }
 0x101   : > { %1488 = vmatprep.subr.bf16.mxu0 %v1737_v7  ;;  %v1001_v50 = vld [vmem:[#allocation3 + $0x8] sm:$0xff] }
 0x102   : > { %v1467_v51 = vpop.f32.mrf.mxu0  ;;  %1483 = vmatpush3.bf16.msra.mxu1 %v1619_v53 }
 0x103   : > { %1496 = vmatprep.subr.bf16.mxu1 %v1737_v7 }
 0x105   : > { %1485 = vmatmul.mubr.msk.bf16.vlgmr.msra.gmra.mxu1 %vm468_vm3, %v1918_v12 }
 0x106   : > { %1500 = vmatprep.mubr.msk.bf16.mxu1 %vm1738_vm2, %v1737_v7  ;;  %1497 = vmatpush3.bf16.msra.mxu1 %v1620_v15 }
 0x107   : > { %1498 = vmatprep.subr.bf16.mxu1 %v1737_v7 }
 0x10a   : > { %1499 = vmatpush3.bf16.msra.mxu1 %v1621_v16 }
 0x10b   : > { %1510 = vmatprep.subr.bf16.mxu1 %v1737_v7 }
 0x10d   : > { %1501 = vmatmul.mubr.msk.bf16.vlgmr.msra.gmra.mxu1 %vm468_vm3, %v1914_v11 }
 0x10e   : > { %1512 = vmatprep.mubr.msk.bf16.mxu1 %vm1738_vm2, %v1737_v7 }
 0x1bd   : > { %v670_v33 = vpop.f32.mrf.mxu1 }
 0x1be   : > { %v676_v34 = vmul.f32 0.17677669, %v670_v33 }
 0x1bf   : > { %v1472_v37 = vpop.f32.mrf.mxu1 }
 0x1c0   : > { %v677_v38 = vadd.f32 %v676_v34, %v1948_v36 }
 0x1c1   : > { %v673_v39 = vpop.f32.mrf.mxu1 }
 0x1c2   : > { %v680_v40 = vsel %vm679_vm8, %v677_v38, -inf }
 0x1c3   : > { %v1473_v41 = vpop.f32.mrf.mxu1  ;;  %681 = vmax.xlane.f32.xlu1 %v680_v40 }
 0x1c5   : > { %v813_v61 = vpop.f32.mrf.mxu1 }
 0x1c6   : > { %v933_v14 = vpack.c.bf16 %v813_v61, %v813_v61 }
 0x1c7   : > { %v1486_v62 = vpop.f32.mrf.mxu1 }
 0x1c9   : > { %v816_v63 = vpop.f32.mrf.mxu1 }
 0x1cb   : > { %v1487_v0 = vpop.f32.mrf.mxu1 }
 0x24c   : > { %v682_v43 = vpop.xlane.xlu1 %681 }
 0x24d   : > { %v1955_v44 = vmax.f32 %v1952_v42, %v682_v43 }
 0x24f   : > { %v684_v45 = vsub.f32 %v1952_v42, %v1955_v44  ;;  %761 = vst.msk [vmem:[#allocation2] sm:$0xff] %vm701_vm9, %v1955_v44  ;;  %689 = vperm.xlu1 %1609, %v1955_v44   ;;  %v1009_v44 = vld [vmem:[#allocation4 + $0x8] sm:$0xff] }
 0x251   : > { %v685_v41 = vmul.f32 1.442695, %v684_v45 }
 0x2ca   : > { %v690_v54 = vpop.permute.xlu1 %689 }
 0x2cb   : > { %v692_v55 = vsub.f32 %v677_v38, %v690_v54  ;;  %v703_v54 = vld [vmem:[#allocation4] sm:$0xff] }
 0x2cd   : > { %v693_v56 = vmul.f32 1.442695, %v692_v55 }
 0x2cf   : > { %1622 = vpow2.f32 %v693_v56 }
 0x2dc   : > { %v1623_v57 = vpop.eup %1622 }
 0x2dd   : > { %v710_v59 = vpack.c.bf16 %v1623_v57, %v1623_v57  ;;  %v697_v33 = vsel %vm679_vm8, %v1623_v57, 0.0 }
 0x2df   : > { %1477 = vmatmul.mubr.msk.bf16.vlgmr.msra.gmra.mxu0 %vm679_vm8, %v710_v59 }
 0x2e0   : > { %1489 = vmatpush3.bf16.msra.mxu0 %v1616_v58  ;;  %1492 = vmatprep.mubr.msk.bf16.mxu0 %vm1738_vm2, %v1737_v7 }
 0x2e1   : > { %1490 = vmatprep.subr.bf16.mxu0 %v1737_v7 }
 0x2e4   : > { %1491 = vmatpush3.bf16.msra.mxu0 %v1618_v60 }
 0x2e5   : > { %1504 = vmatprep.subr.bf16.mxu0 %v1737_v7 }
 0x2e7   : > { %1493 = vmatmul.mubr.msk.bf16.vlgmr.msra.gmra.mxu0 %vm468_vm3, %v1914_v11  ;;  %v927_v11 = vpop.f32.mrf.mxu1 }
 0x2e8   : > { %1506 = vmatprep.mubr.msk.bf16.mxu0 %vm1738_vm2, %v1737_v7  ;;  %v1017_v27 = vpack.c.bf16 %v927_v11, %v927_v11 }
 0x2e9   : > { %v1502_v28 = vpop.f32.mrf.mxu1 }
 0x2ea   : > { %v1022_v7 = vsel %vm715_vm10, %v1017_v27, 0 }
 0x2eb   : > { %v930_v29 = vpop.f32.mrf.mxu1  ;;  %1511 = vmatpush3.bf16.msra.mxu1 %v1022_v7 }
 0x2ed   : > { %v1503_v30 = vpop.f32.mrf.mxu1 }
 0x39f   : > { %v1991_v1 = vpop.f32.mrf.mxu0 }
 0x3a1   : > { %v1478_v3 = vpop.f32.mrf.mxu0 }
 0x3a3   : > { %v756_v4 = vpop.f32.mrf.mxu0 }
 0x3a5   : > { %v1479_v5 = vpop.f32.mrf.mxu0 }
 0x3a7   : > { %v870_v6 = vpop.f32.mrf.mxu0 }
 0x3a8   : > { %v934_v8 = vpack.c.bf16 %v870_v6, %v870_v6 }
 0x3a9   : > { %v1494_v9 = vpop.f32.mrf.mxu0 }
 0x3aa   : > { %v939_v10 = vsel %vm629_vm4, %v934_v8, 0 }
 0x3ab   : > { %v873_v12 = vpop.f32.mrf.mxu0  ;;  %1505 = vmatpush3.bf16.xpose.msra.mxu0 %v939_v10 }
 0x3ad   : > { %v1495_v13 = vpop.f32.mrf.mxu0 }
 0x3b2   : > { %1507 = vmatmul.mubr.msk.bf16.vlgmr.msra.gmra.mxu0 %vm629_vm4, %v933_v14 }
 0x472   : > { %v975_v17 = vpop.f32.mrf.mxu0 }
 0x473   : > { %v981_v18 = vmul.f32 0.17677669, %v975_v17 }
 0x474   : > { %v1508_v19 = vpop.f32.mrf.mxu0 }
 0x475   : > { %v982_v20 = vadd.f32 %v981_v18, %v1948_v36 }
 0x476   : > { %v978_v21 = vpop.f32.mrf.mxu0 }
 0x477   : > { %v985_v22 = vsel %vm679_vm8, %v982_v20, -inf }
 0x478   : > { %986 = vmax.xlane.f32.xlu0 %v985_v22  ;;  %v1509_v23 = vpop.f32.mrf.mxu0 }
 0x501   : > { %v987_v25 = vpop.xlane.xlu0 %986 }
 0x502   : > { %v988_v26 = vmax.f32 %v984_v24, %v987_v25 }
 0x504   : > { %1066 = vst.msk [vmem:[#allocation2 + $0x8] sm:$0xff] %vm701_vm9, %v988_v26  ;;  %994 = vperm.xlu1 %1609, %v988_v26   ;;  %v989_v31 = vsub.f32 %v984_v24, %v988_v26 }
 0x506   : > { %v990_v32 = vmul.f32 1.442695, %v989_v31 }
 0x508   : > { %1624 = vpow2.f32 %v990_v32 }
 0x515   : > { %v1625_v34 = vpop.eup %1624 }
 0x516   : > { %v1002_v51 = vmul.f32 %v1625_v34, %v1001_v50 }
 0x528   : > { %698 = vadd.xlane.f32.xlu1 %v697_v33 }
 0x539   : > { %1012 = vperm.xlu1 %1609, %v1625_v34  }
 0x57f   : > { %v995_v35 = vpop.permute.xlu1 %994 }
 0x580   : > { %v997_v36 = vsub.f32 %v982_v20, %v995_v35 }
 0x582   : > { %v998_v37 = vmul.f32 1.442695, %v997_v36 }
 0x584   : > { %1626 = vpow2.f32 %v998_v37 }
 0x585   : > { %1628 = vpow2.f32 %v685_v41 }
 0x591   : > { %v1627_v38 = vpop.eup %1626 }
 0x592   : > { %v1003_v39 = vsel %vm679_vm8, %v1627_v38, 0.0  ;;  %v1016_v40 = vpack.c.bf16 %v1627_v38, %v1627_v38  ;;  %v1629_v43 = vpop.eup %1628 }
 0x593   : > { %1004 = vadd.xlane.f32.xlu0 %v1003_v39  ;;  %v696_v47 = vmul.f32 %v1629_v43, %v695_v46 }
 0x594   : > { %1513 = vmatmul.mubr.msk.bf16.vlgmr.msra.gmra.mxu1 %vm679_vm8, %v1016_v40 }
 0x5a9   : > { %706 = vperm.xlu0 %1608, %v1629_v43  }
 0x5b1   : > { %v699_v48 = vpop.xlane.xlu1 %698 }
 0x5b2   : > { %v700_v49 = vadd.f32 %v699_v48, %v696_v47 }
 0x5b4   : > { %702 = vst.msk [vmem:[#allocation3] sm:$0xff] %vm701_vm9, %v700_v49 }
 0x5b5   : > { %v1013_v45 = vpop.permute.xlu1 %1012 }
 0x5b6   : > { %v1015_v57 = vmul.f32 %v1013_v45, %v1009_v44 }
 0x61c   : > { %v1005_v52 = vpop.xlane.xlu0 %1004 }
 0x61d   : > { %v1006_v53 = vadd.f32 %v1005_v52, %v1002_v51 }
 0x61f   : > { %1007 = vst.msk [vmem:[#allocation3 + $0x8] sm:$0xff] %vm701_vm9, %v1006_v53 }
 0x624   : > { %v707_v55 = vpop.permute.xlu0 %706 }
 0x625   : > { %v709_v56 = vmul.f32 %v707_v55, %v703_v54 }
 0x627   : > { %v759_v42 = vadd.f32 %v1991_v1, %v709_v56 }
 0x629   : > { %760 = vst.msk [vmem:[#allocation4] sm:$0xff] %vm629_vm4, %v759_v42 }
 0x654   : > { %v1058_v58 = vpop.f32.mrf.mxu1 }
 0x655   : > { %v1064_v59 = vadd.f32 %v1058_v58, %v1015_v57 }
 0x656   : > { %v1514_v60 = vpop.f32.mrf.mxu1  ;;  %1070 = sbr.rel (%p1401_p1) target bundleno = 2296 (0x8f8), region = 68 }
 0x657   : > { %1065 = vst.msk [vmem:[#allocation4 + $0x8] sm:$0xff] %vm629_vm4, %v1064_v59 }
 0x658   : > { %v1061_v61 = vpop.f32.mrf.mxu1 }
 0x65a   : > { %v1515_v62 = vpop.f32.mrf.mxu1 }
 0x65b   : > { %v1072_v63 = vld [vmem:[#allocation3] sm:$0xff]  ;;  %v1134_v0 = vld [vmem:[#allocation3 + $0x8] sm:$0xff]  ;;  %v1741_v3 = vmov 0   ;;  %v1631_v1 = vld [vmem:[%s2098_s7] sm:$0xff]   ;;  %v1742_v4 = vmov 0.0   ;;  %vm1743_vm11 = vmmov 0  }
 0x65c   : > { %1630 = vset.pattern.permute.xlu0 %v1741_v3  ;;  %1633 = vrcp.f32 %v1072_v63  ;;  %1516 = vmatprep.subr.bf16.mxu0 %v1742_v4  ;;  %v1632_v6 = vld [vmem:[%s2098_s7 + $0x8] sm:$0xff]   ;;  %v1071_v9 = vld [vmem:[#allocation4] sm:$0xff] }
 0x65d   : > { %1635 = vrcp.f32 %v1134_v0  ;;  %1522 = vmatprep.subr.bf16.mxu1 %v1742_v4  ;;  %1517 = vmatpush3.bf16.msra.mxu0 %v1631_v1  ;;  %v1408_v40 = vld [vmem:[%s2099_s8] ss:$0 sm:$0xff] }
 0x65e   : > { %1518 = vmatprep.mubr.msk.bf16.mxu0 %vm1743_vm11, %v1742_v4  ;;  %1524 = vmatprep.mubr.msk.bf16.mxu1 %vm1743_vm11, %v1742_v4  ;;  %v1133_v13 = vld [vmem:[#allocation4 + $0x8] sm:$0xff]  ;;  %v1409_v43 = vld [vmem:[%s2100_s9] ss:$0 sm:$0xff] }
 0x65f   : > { %1523 = vmatpush3.bf16.msra.mxu1 %v1632_v6 }
 0x669   : > { %v1634_v5 = vpop.eup %1633 }
 0x66a   : > { %1076 = vperm.xlu0 %1630, %v1634_v5   ;;  %v1636_v8 = vpop.eup %1635 }
 0x66e   : > { %1138 = vperm.xlu0 %1630, %v1636_v8  }
 0x6e5   : > { %v1077_v10 = vpop.permute.xlu0 %1076 }
 0x6e6   : > { %v1079_v12 = vmul.f32 %v1077_v10, %v1071_v9 }
 0x6e8   : > { %v1080_v14 = vpack.c.bf16 %v1079_v12, %v1079_v12 }
 0x6e9   : > { %v1139_v15 = vpop.permute.xlu0 %1138 }
 0x6ea   : > { %v1141_v16 = vmul.f32 %v1139_v15, %v1133_v13  ;;  %1519 = vmatmul.mubr.msk.bf16.vlgmr.msra.gmra.mxu0 %vm629_vm4, %v1080_v14 }
 0x6ec   : > { %v1142_v17 = vpack.c.bf16 %v1141_v16, %v1141_v16 }
 0x6ee   : > { %1525 = vmatmul.mubr.msk.bf16.vlgmr.msra.gmra.mxu1 %vm629_vm4, %v1142_v17 }
 0x7aa   : > { %v1126_v18 = vpop.f32.mrf.mxu0 }
 0x7ab   : > { %v1132_v20 = vadd.f32 %v1126_v18, %v1890_v2 }
 0x7ac   : > { %v1520_v19 = vpop.f32.mrf.mxu0 }
 0x7ae   : > { %v1129_v21 = vpop.f32.mrf.mxu0  ;;  %v1189_v22 = vpop.f32.mrf.mxu1 }
 0x7af   : > { %v1195_v23 = vadd.f32 %v1189_v22, %v1132_v20 }
 0x7b0   : > { %v1521_v24 = vpop.f32.mrf.mxu0  ;;  %v1526_v25 = vpop.f32.mrf.mxu1 }
 0x7b1   : > { %v1198_v26 = vsel %vm468_vm3, %v1195_v23, 0.0 }
 0x7b2   : > { %v1192_v11 = vpop.f32.mrf.mxu1  ;;  %1199 = vadd.xlane.f32.xlu1 %v1198_v26 }
 0x7b4   : > { %v1527_v27 = vpop.f32.mrf.mxu1 }
 0x83b   : > { %v1200_v28 = vpop.xlane.xlu1 %1199 }
 0x83c   : > { %v1202_v7 = vmul.f32 0.03125, %v1200_v28 }
 0x83e   : > { %v1203_v29 = vsub.f32 %v1195_v23, %v1202_v7 }
 0x840   : > { %v1204_v30 = vmul.f32 %v1203_v29, %v1203_v29 }
 0x842   : > { %v1205_v31 = vsel %vm468_vm3, %v1204_v30, 0.0 }
 0x843   : > { %1206 = vadd.xlane.f32.xlu1 %v1205_v31 }
 0x8cc   : > { %v1207_v32 = vpop.xlane.xlu1 %1206 }
 0x8cd   : > { %v1209_v33 = vmul.f32 0.032258064, %v1207_v32 }
 0x8cf   : > { %1637 = vrsqrt.f32 %v1209_v33  ;;  %vm1212_vm12 = vcmp.eq.f32.partialorder %v1209_v33, inf  ;;  %v1215_v35 = vand.u32 2147483648, %v1209_v33  ;;  %vm1214_vm13 = vcmp.eq.f32.partialorder %v1209_v33, 0.0 }
 0x8dc   : > { %v1638_v2 = vpop.eup %1637 }
 0x8dd   : > { %v1211_v34 = vmul.f32 %v1638_v2, %v1209_v33 }
 0x8df   : > { %v1213_v36 = vsel %vm1212_vm12, %v1209_v33, %v1211_v34 }
 0x8e0   : > { %v1216_v37 = vsel %vm1214_vm13, %v1215_v35, %v1213_v36 }
 0x8e1   : > { %v1217_v38 = vadd.f32 0.001, %v1216_v37 }
 0x8e3   : > { %1639 = vrcp.f32 %v1217_v38 }
 0x8f0   : > { %v1640_v39 = vpop.eup %1639 }
 0x8f1   : > { %v1219_v41 = vmul.f32 %v1640_v39, %v1203_v29 }
 0x8f3   : > { %v1226_v46 = vmul.f32 %v1408_v40, %v1219_v41 }
 0x8f5   : > { %v1233_v47 = vadd.f32 %v1409_v43, %v1226_v46 }
 0x8f7   : > { %1234 = vst.msk [vmem:[%s401_s12] sm:$0xff] %vm468_vm3, %v1233_v47 }
 0x8f8 PF: > { %s1411_s10 = sshll.u32 %s1721_s17, 7  ;;  %s2124_s20 = sld [smem:[#allocation17_spill]] }
 0x8f9   : > { %s1249_s26 = sshll.u32 %s401_s12, 4  ;;  %s2126_s29 = sand.u32 1, %s1709_s14   ;;  %s1250_s26 = int_to_ptr.vmem [resolvable:$true] %s1249_s26 }
 0x8fa   : > { %s1236_s30 = scalar_lea.sflag [#allocation6], %s2126_s29  ;;  %s1641_s21 = scalar_lea.vmem %s1250_s26, 128 }
 0x8fb   : > { %p1642_p2 = scmp.ne.s32.totalorder %s1250_s26, %s1641_s21  ;;  %s1744_s22 = smov [#allocation5]  }
 0x8fc   : > { %s1645_s16 = sshll.u32 %s1744_s22, 4  ;;  %s1646_s16 = int_to_ptr.vmem [resolvable:$false] %s1645_s16 }
 0x8fd   : > { %p1643_p4 = pnand %p1642_p2, %p1849_p3  ;;  %s1647_s27 = scalar_lea.vmem %s1646_s16, 256 }
 0x8fe   : > { %s2125_s23 = smov %s2124_s20  ;;  %s1247_s24 = scalar_lea.hbm %s2124_s20, %s1411_s10 }
 0x8ff   : > { %p1644_p5 = pneg %p1643_p4  ;;  %p1648_p6 = scmp.lt.s32.totalorder %s1250_s26, %s1646_s16 }
 0x900   : > { %p1649_p7 = scmp.lt.s32.totalorder %s1647_s27, %s1641_s21 }
 0x902   : > { %p1650_p8 = por %p1649_p7, %p1648_p6 }
 0x904   : > { %p1651_p10 = pnand %p1650_p8, %p1644_p5 }
 0x906   : > { %1654 = shalt.err (!%p1651_p10)
}
 0x907   : > { %s1655_s17 = scalar_lea.hbm %s1247_s24, 128  ;;  %s1659_s28 = scalar_lea.hbm %s2125_s23, 256 }
 0x908   : > { %p1656_p11 = scmp.ne.s32.totalorder %s1247_s24, %s1655_s17  ;;  %p1660_p0 = scmp.lt.s32.totalorder %s1247_s24, %s2125_s23 }
 0x909   : > { %p1661_p1 = scmp.lt.s32.totalorder %s1659_s28, %s1655_s17 }
 0x90a   : > { %p1657_p12 = pnand %p1656_p11, %p1849_p3 }
 0x90b   : > { %p1662_p2 = por %p1661_p1, %p1660_p0 }
 0x90c   : > { %p1658_p13 = pneg %p1657_p12 }
 0x90e   : > { %p1663_p4 = pnand %p1662_p2, %p1658_p13 }
 0x910   : > { %1666 = shalt.err (!%p1663_p4)
}
 0x911   : > { %1528 = dma.vmem_to_hbm [thread:$0]  (%p1849_p3), %s1250_s26, 128, %s1247_s24, %s1236_s30  }
 0x912 PF: > { %s2127_s10 = sld [smem:[#allocation12_spill]] }
 0x913   : > { %s2128_s18 = sld [smem:[#allocation8_spill]] }
 0x918   : > { %p1534_p5 = scmp.ge.s32.totalorder %s2127_s10, 2 }
 0x919   : > { %s1261_s20 = sand.u32 1, %s2128_s18  }
 0x91a   : > { %p1531_p6 = pnand %p1534_p5, %p1859_p9  ;;  %s1262_s29 = scalar_lea.sflag [#allocation6], %s1261_s20 }
 0x91c   : > { %p1532_p7 = pneg %p1531_p6 }
 0x91e   : > { %1700 = dma.done.wait (%p1532_p7), %s1262_s29, 128  }
 0x91f   : > { %1702 = vsyncadd (%p1532_p7), %s1262_s29, 4294967168  ;;  %s23_s20 = sadd.s32 1, %s2127_s10   ;;  %s2130_s21 = sld [smem:[#allocation9_spill]] }
 0x920   : > { %p20_p8 = scmp.ge.s32.totalorder %s23_s20, 6   ;;  %s2131_s15 = sld [smem:[#allocation16_spill]] }
 0x921   : > { %s2132_s16 = sld [smem:[#allocation10_spill]]  ;;  %s2136_s13 = smov %s1709_s14 }
 0x922   : > { %s2133_s17 = sld [smem:[#allocation11_spill]]  ;;  %22 = sbr.rel (!%p20_p8) target bundleno = 7 (0x7), region = 119 }
 0x923   : > { %s2134_s18 = sld [smem:[#allocation13_spill]] }
 0x924   : > { %s2135_s19 = sld [smem:[#allocation14_spill]] }
 0x925   : > { %s2137_s14 = smov %s2130_s21 }
 0x927   :  { %1267 = vsyncpa [#allocation6], 1 }
 0x928   :  { %1269 = vsyncpa [#allocation6 + $0x1], 1 }

</bundles_post_ra>
